<compile_context>
chip_gen: v7x
topology: tpu7x:2x2x1
jax: 0.10.0
libtpu: 0.0.40
codegen_flags: <defaults>
</compile_context>

<pallas_src>
import jax
import jax.numpy as jnp
from jax.experimental import pallas as pl
from jax.experimental.pallas import tpu as pltpu


def _vmem_capacity_bytes():
    """Physical VMEM of the current chip, with a conservative fallback."""
    try:
        return int(pltpu.get_tpu_info().vmem_capacity_bytes)
    except Exception:
        return 64 * 1024 * 1024  # smallest per-core VMEM across v5e/v6e/v7x


def _make_kernel(K, ch_in, ch_out, Wv):
    kci = K * ch_in
    kco = K * ch_out

    def kernel(p_ref, x1_ref, o_ref):
        # p_ref : (ch_out, K*ch_in + 1 + K*ch_out + 1)  packed [W1 | b1 | W2 | b2]
        # x1_ref: (K*ch_in, BT*L1)  conv1 im2col, batch stacked along lanes
        # o_ref : (ch_out, Wv)      conv2 output over the stacked lane axis
        p = p_ref[...]
        w1 = p[:, 0:kci]                        # (co, K*ci)
        b1 = p[:, kci:kci + 1]                  # (co, 1)
        w2 = p[:, kci + 1:kci + 1 + kco]        # (co, K*co)
        b2 = p[:, kci + 1 + kco:kci + 2 + kco]  # (co, 1)

        # Conv1 + ReLU: single lane-dense matmul (contraction dim K*ch_in).
        x1 = x1_ref[...]
        h1 = jnp.maximum(
            jnp.dot(w1, x1, preferred_element_type=jnp.float32) + b1, 0.0)

        # Conv2 + ReLU: per-tap matmuls on lane-shifted slices of h1.
        # Columns whose in-sample position >= L2 mix adjacent samples; they are
        # never read back (wrapper keeps only the first L2 columns per sample).
        acc = jnp.dot(w2[:, 0:ch_out], h1[:, 0:Wv],
                      preferred_element_type=jnp.float32)
        for k in range(1, K):
            acc = acc + jnp.dot(w2[:, k * ch_out:(k + 1) * ch_out],
                                h1[:, k:k + Wv],
                                preferred_element_type=jnp.float32)
        o_ref[...] = jnp.maximum(acc + b2, 0.0).astype(o_ref.dtype)

    return kernel


@jax.jit
def doubleconv_forward(x, w1, b1, w2, b2):
    """x: [N, ch_in, L]; w1: [co, ci, K]; w2: [co, co, K] (PyTorch layout); b: [co]."""
    N, ch_in, L = x.shape
    ch_out, _, K = w1.shape
    L1 = L - (K - 1)
    L2 = L1 - (K - 1)
    assert L2 >= 1

    # --- batch tiling: many samples per grid step, batch stacked along lanes ---
    f32 = 4
    target_lanes = 2048                                   # aim for dense vregs/stores
    bytes_per_sample = f32 * (K * ch_in + (K + 3) * ch_out) * L1
    bt_budget = max(1, (4 << 20) // max(bytes_per_sample, 1))
    BT = int(max(1, min(N, min((target_lanes + L1 - 1) // L1, bt_budget))))
    num_tiles = (N + BT - 1) // BT
    N_pad = num_tiles * BT
    Wv = BT * L1 - (K - 1)            # conv2-valid width over the stacked lane axis

    x_p = x.astype(jnp.float32)
    if N_pad != N:
        x_p = jnp.pad(x_p, ((0, N_pad - N), (0, 0), (0, 0)))

    # --- conv1 im2col in the wrapper (XLA) => one fat matmul in the kernel ---
    taps = jnp.stack([x_p[:, :, k:k + L1] for k in range(K)], axis=0)   # (K,Np,ci,L1)
    x1 = taps.transpose(0, 2, 1, 3).reshape(K * ch_in, N_pad * L1)      # (K*ci, Np*L1)
    x1 = x1.reshape(K * ch_in, num_tiles, BT * L1).transpose(1, 0, 2)   # (nt,K*ci,BT*L1)

    # --- pack all parameters into a single f32 array => one resident DMA ---
    w1f = jnp.transpose(w1, (0, 2, 1)).reshape(ch_out, K * ch_in).astype(jnp.float32)
    w2f = jnp.transpose(w2, (0, 2, 1)).reshape(ch_out, K * ch_out).astype(jnp.float32)
    params = jnp.concatenate(
        [w1f, b1.reshape(ch_out, 1).astype(jnp.float32),
         w2f, b2.reshape(ch_out, 1).astype(jnp.float32)], axis=1)
    pcols = params.shape[1]

    # --- VMEM budget from the real footprint, capped by the chip's capacity ---
    block_bytes = f32 * (K * ch_in * BT * L1 + ch_out * Wv)      # x1 + out blocks
    live_bytes = f32 * ch_out * (2 * BT * L1 + 2 * Wv)           # h1 / slices / acc
    footprint = 2 * block_bytes + 2 * f32 * ch_out * pcols + live_bytes
    vmem_limit = int(min(0.75 * _vmem_capacity_bytes(),
                         max(4 * footprint, 4 << 20)))

    kernel = _make_kernel(K, ch_in, ch_out, Wv)

    out_t = pl.pallas_call(
        kernel,
        out_shape=jax.ShapeDtypeStruct((num_tiles, ch_out, Wv), jnp.float32),
        grid=(num_tiles,),
        in_specs=[
            # Packed parameters: constant block index -> DMA'd once, resident.
            pl.BlockSpec((ch_out, pcols), lambda i: (0, 0)),
            # One batch tile (BT samples, lane-stacked) per grid step.
            pl.BlockSpec((None, K * ch_in, BT * L1), lambda i: (i, 0, 0)),
        ],
        out_specs=pl.BlockSpec((None, ch_out, Wv), lambda i: (i, 0, 0)),
        compiler_params=pltpu.CompilerParams(
            # Only shard across TensorCores when each core gets real work.
            dimension_semantics=("parallel",) if num_tiles >= 2 else ("arbitrary",),
            vmem_limit_bytes=vmem_limit,
        ),
    )(params, x1)

    # --- unstack batch from the lane axis; drop cross-sample junk columns ---
    out = jnp.pad(out_t, ((0, 0), (0, 0), (0, K - 1)))              # (nt, co, BT*L1)
    out = out.reshape(num_tiles, ch_out, BT, L1).transpose(0, 2, 1, 3)
    out = out.reshape(N_pad, ch_out, L1)[:N, :, :L2]                # (N, co, L2)
    return out


def doubleconv_reference(x, w1, b1, w2, b2):
    """Pure-JAX reference (valid Conv1d -> ReLU, twice)."""
    def conv1d_valid(inp, w, b):
        co, ci, k = w.shape
        lo = inp.shape[-1] - (k - 1)
        acc = jnp.zeros((inp.shape[0], co, lo), jnp.float32)
        for t in range(k):
            acc = acc + jnp.einsum('oc,ncl->nol', w[:, :, t], inp[:, :, t:t + lo])
        return acc + b[None, :, None]

    h = jnp.maximum(conv1d_valid(x, w1, b1), 0.0)
    return jnp.maximum(conv1d_valid(h, w2, b2), 0.0)


if __name__ == "__main__":
    ch_in, ch_out, batch, length, K = 4, 8, 2, 32, 5

    key = jax.random.PRNGKey(0)
    kx, kw1, kb1, kw2, kb2 = jax.random.split(key, 5)

    x = jax.random.normal(kx, (batch, ch_in, length), dtype=jnp.float32)

    # PyTorch Conv1d default init: U(-1/sqrt(fan_in), 1/sqrt(fan_in)), fan_in = ci*K.
    bound1 = 1.0 / (ch_in * K) ** 0.5
    w1 = jax.random.uniform(kw1, (ch_out, ch_in, K),
                            minval=-bound1, maxval=bound1, dtype=jnp.float32)
    b1 = jax.random.uniform(kb1, (ch_out,),
                            minval=-bound1, maxval=bound1, dtype=jnp.float32)
    bound2 = 1.0 / (ch_out * K) ** 0.5
    w2 = jax.random.uniform(kw2, (ch_out, ch_out, K),
                            minval=-bound2, maxval=bound2, dtype=jnp.float32)
    b2 = jax.random.uniform(kb2, (ch_out,),
                            minval=-bound2, maxval=bound2, dtype=jnp.float32)

    out = doubleconv_forward(x, w1, b1, w2, b2)
    out = jax.block_until_ready(out)

    ref = doubleconv_reference(x, w1, b1, w2, b2)
    assert out.shape == (batch, ch_out, length - 2 * (K - 1)), out.shape
    assert jnp.allclose(out, ref, atol=1e-5, rtol=1e-5), \
        float(jnp.max(jnp.abs(out - ref)))

    print("KERNEL_OK")
</pallas_src>

<mosaic_0001>
module attributes {stable_mosaic.version = 11 : i64} {
  func.func @kernel(%arg0: i32, %arg1: memref<8x62xf32, #tpu.memory_space<vmem>>, %arg2: memref<1x20x56xf32, #tpu.memory_space<vmem>>, %arg3: memref<1x8x52xf32, #tpu.memory_space<vmem>>) attributes {dimension_semantics = [#tpu.dimension_semantics<arbitrary>], iteration_bounds = array<i64: 1>, scalar_prefetch = 0 : i64, scratch_operands = 0 : i64, tpu.core_type = #tpu.core_type<tc>, window_params = [{pipeline_mode = #tpu.pipeline_mode<synchronous>, transform_indices = @transform_0, window_bounds = array<i64: 8, 62>}, {transform_indices = @transform_1, window_bounds = array<i64: 1, 20, 56>}, {transform_indices = @transform_2, window_bounds = array<i64: 1, 8, 52>}]} {
    %c0 = arith.constant 0 : index
    %c0_0 = arith.constant 0 : index
    %0 = vector.load %arg1[%c0, %c0_0] : memref<8x62xf32, #tpu.memory_space<vmem>>, vector<8x62xf32>
    %1 = vector.extract_strided_slice %0 {offsets = [0, 0], sizes = [8, 20], strides = [1, 1]} : vector<8x62xf32> to vector<8x20xf32>
    %2 = vector.extract_strided_slice %0 {offsets = [0, 20], sizes = [8, 1], strides = [1, 1]} : vector<8x62xf32> to vector<8x1xf32>
    %3 = vector.extract_strided_slice %0 {offsets = [0, 21], sizes = [8, 40], strides = [1, 1]} : vector<8x62xf32> to vector<8x40xf32>
    %4 = vector.extract_strided_slice %0 {offsets = [0, 61], sizes = [8, 1], strides = [1, 1]} : vector<8x62xf32> to vector<8x1xf32>
    %c0_1 = arith.constant 0 : index
    %c0_2 = arith.constant 0 : index
    %c0_3 = arith.constant 0 : index
    %5 = vector.load %arg2[%c0_1, %c0_2, %c0_3] : memref<1x20x56xf32, #tpu.memory_space<vmem>>, vector<1x20x56xf32>
    %6 = vector.shape_cast %5 : vector<1x20x56xf32> to vector<20x56xf32>
    %cst = arith.constant dense<0.000000e+00> : vector<8x56xf32>
    %7 = tpu.matmul %1, %6, %cst {dimension_numbers = #tpu.dot_dimension_numbers<[1], [0], [0], [1], [0, 0, 1, 1], [], []>} : vector<8x20xf32>, vector<20x56xf32>, vector<8x56xf32> -> vector<8x56xf32>
    %8 = vector.broadcast %2 : vector<8x1xf32> to vector<8x56xf32>
    %9 = arith.addf %7, %8 : vector<8x56xf32>
    %cst_4 = arith.constant 0.000000e+00 : f32
    %10 = vector.broadcast %cst_4 : f32 to vector<8x56xf32>
    %11 = arith.maximumf %9, %10 : vector<8x56xf32>
    %12 = vector.extract_strided_slice %3 {offsets = [0, 0], sizes = [8, 8], strides = [1, 1]} : vector<8x40xf32> to vector<8x8xf32>
    %13 = vector.extract_strided_slice %11 {offsets = [0, 0], sizes = [8, 52], strides = [1, 1]} : vector<8x56xf32> to vector<8x52xf32>
    %cst_5 = arith.constant dense<0.000000e+00> : vector<8x52xf32>
    %14 = tpu.matmul %12, %13, %cst_5 {dimension_numbers = #tpu.dot_dimension_numbers<[1], [0], [0], [1], [0, 0, 1, 1], [], []>} : vector<8x8xf32>, vector<8x52xf32>, vector<8x52xf32> -> vector<8x52xf32>
    %15 = vector.extract_strided_slice %3 {offsets = [0, 8], sizes = [8, 8], strides = [1, 1]} : vector<8x40xf32> to vector<8x8xf32>
    %16 = vector.extract_strided_slice %11 {offsets = [0, 1], sizes = [8, 52], strides = [1, 1]} : vector<8x56xf32> to vector<8x52xf32>
    %cst_6 = arith.constant dense<0.000000e+00> : vector<8x52xf32>
    %17 = tpu.matmul %15, %16, %cst_6 {dimension_numbers = #tpu.dot_dimension_numbers<[1], [0], [0], [1], [0, 0, 1, 1], [], []>} : vector<8x8xf32>, vector<8x52xf32>, vector<8x52xf32> -> vector<8x52xf32>
    %18 = arith.addf %14, %17 : vector<8x52xf32>
    %19 = vector.extract_strided_slice %3 {offsets = [0, 16], sizes = [8, 8], strides = [1, 1]} : vector<8x40xf32> to vector<8x8xf32>
    %20 = vector.extract_strided_slice %11 {offsets = [0, 2], sizes = [8, 52], strides = [1, 1]} : vector<8x56xf32> to vector<8x52xf32>
    %cst_7 = arith.constant dense<0.000000e+00> : vector<8x52xf32>
    %21 = tpu.matmul %19, %20, %cst_7 {dimension_numbers = #tpu.dot_dimension_numbers<[1], [0], [0], [1], [0, 0, 1, 1], [], []>} : vector<8x8xf32>, vector<8x52xf32>, vector<8x52xf32> -> vector<8x52xf32>
    %22 = arith.addf %18, %21 : vector<8x52xf32>
    %23 = vector.extract_strided_slice %3 {offsets = [0, 24], sizes = [8, 8], strides = [1, 1]} : vector<8x40xf32> to vector<8x8xf32>
    %24 = vector.extract_strided_slice %11 {offsets = [0, 3], sizes = [8, 52], strides = [1, 1]} : vector<8x56xf32> to vector<8x52xf32>
    %cst_8 = arith.constant dense<0.000000e+00> : vector<8x52xf32>
    %25 = tpu.matmul %23, %24, %cst_8 {dimension_numbers = #tpu.dot_dimension_numbers<[1], [0], [0], [1], [0, 0, 1, 1], [], []>} : vector<8x8xf32>, vector<8x52xf32>, vector<8x52xf32> -> vector<8x52xf32>
    %26 = arith.addf %22, %25 : vector<8x52xf32>
    %27 = vector.extract_strided_slice %3 {offsets = [0, 32], sizes = [8, 8], strides = [1, 1]} : vector<8x40xf32> to vector<8x8xf32>
    %28 = vector.extract_strided_slice %11 {offsets = [0, 4], sizes = [8, 52], strides = [1, 1]} : vector<8x56xf32> to vector<8x52xf32>
    %cst_9 = arith.constant dense<0.000000e+00> : vector<8x52xf32>
    %29 = tpu.matmul %27, %28, %cst_9 {dimension_numbers = #tpu.dot_dimension_numbers<[1], [0], [0], [1], [0, 0, 1, 1], [], []>} : vector<8x8xf32>, vector<8x52xf32>, vector<8x52xf32> -> vector<8x52xf32>
    %30 = arith.addf %26, %29 : vector<8x52xf32>
    %31 = vector.broadcast %4 : vector<8x1xf32> to vector<8x52xf32>
    %32 = arith.addf %30, %31 : vector<8x52xf32>
    %cst_10 = arith.constant 0.000000e+00 : f32
    %33 = vector.broadcast %cst_10 : f32 to vector<8x52xf32>
    %34 = arith.maximumf %32, %33 : vector<8x52xf32>
    %c0_11 = arith.constant 0 : index
    %c0_12 = arith.constant 0 : index
    %c0_13 = arith.constant 0 : index
    %35 = vector.load %arg3[%c0_11, %c0_12, %c0_13] : memref<1x8x52xf32, #tpu.memory_space<vmem>>, vector<1x8x52xf32>
    %36 = vector.shape_cast %35 : vector<1x8x52xf32> to vector<8x52xf32>
    %37 = vector.shape_cast %34 : vector<8x52xf32> to vector<1x8x52xf32>
    tpu.vector_store %arg3[%c0_11, %c0_12, %c0_13], %37 {strides = array<i32>} : memref<1x8x52xf32, #tpu.memory_space<vmem>>, vector<1x8x52xf32>,
    return
  }
  func.func @transform_0(%arg0: i32) -> (i32, i32) {
    %c0_i32 = arith.constant 0 : i32
    %c0_i32_0 = arith.constant 0 : i32
    %c0_i32_1 = arith.constant 0 : i32
    return %c0_i32, %c0_i32_0 : i32, i32
  }
  func.func @transform_1(%arg0: i32) -> (i32, i32, i32) {
    %c0_i32 = arith.constant 0 : i32
    %c0_i32_0 = arith.constant 0 : i32
    %c0_i32_1 = arith.constant 0 : i32
    return %arg0, %c0_i32, %c0_i32_0 : i32, i32, i32
  }
  func.func @transform_2(%arg0: i32) -> (i32, i32, i32) {
    %c0_i32 = arith.constant 0 : i32
    %c0_i32_0 = arith.constant 0 : i32
    %c0_i32_1 = arith.constant 0 : i32
    return %arg0, %c0_i32, %c0_i32_0 : i32, i32, i32
  }
}

</mosaic_0001>

<bundles_post_ra>
// kernel: doubleconv_forward.1
= control target key start
LH: loop header
LB: loop body
LE: loop exit
PB: predicated region body
PF: predicated region fallthrough
CT: control target
= control target key end

     0   :  { %v571_v0 = vmov 0.0|0.0   ;;  %vm572_vm0 = vmmov 0   ;;  %v573_v3 = vmov 0.0   ;;  %v574_v6 = vmov 20   ;;  %s576_s17 = smov 107   ;;  %s577_s18 = smov 91   ;;  %s638_s1 = inlined_call_operand.vmem [shape: f32[1,20,56], index: 1, kind: input, shape index: {}]   ;;  %s639_s0 = inlined_call_operand.vmem [shape: f32[8,62], index: 0, kind: input, shape index: {}]   ;;  %s640_s2 = inlined_call_operand.vmem [shape: f32[1,8,52], index: 2, kind: output, shape index: {}]  }
   0x1   :  { %552 = vmatprep.subr.bf16.mxu0 %v571_v0  ;;  %v12_v1 = vld [vmem:[%s638_s1] sm:$0xff]  ;;  %v13_v2 = vld [vmem:[%s638_s1 + $0x8] sm:$0xff]  ;;  %524 = vmatprep.mubr.msk.f32.mxu0 %vm572_vm0, %v573_v3  ;;  %v14_v7 = vld [vmem:[%s638_s1 + $0x10] sm:$0xf]  ;;  %vm23_vm1 = vcmask 1043456   ;;  %vm20_vm2 = vcmask 162816  }
   0x2   :  { %v553_v4 = vpack.c.bf16 %v13_v2, %v12_v1  ;;  %v11_v5 = vld [vmem:[%s639_s0] sm:$0xff]  ;;  %569 = vset.pattern.permute.xlu0 %v574_v6  ;;  %527 = vmatprep.subr.mxu1 %v573_v3  ;;  %s575_s0 = smov 99   ;;  %s578_s19 = smov 83   ;;  %v581_v13 = vmov 61   ;;  %vm104_vm3 = vcmask 64512   ;;  %vm491_vm4 = vcmask 424960  }
   0x3   :  { %17 = vperm.xlu0 %569, %v11_v5   ;;  %529 = vmatprep.mubr.msk.f32.mxu1 %vm572_vm0, %v573_v3  ;;  %s579_s20 = smov 75   ;;  %s580_s1 = smov 127  }
   0x4   :  { %554 = vmatpush3.bf16.msra.mxu0 %v553_v4  ;;  %98 = vrot.lane.b32.xlu1 %v11_v5, %s575_s0  ;;  %s582_s21 = smov 126   ;;  %s583_s22 = smov 125  }
   0x5   :  { %522 = vmatprep.subr.mxu0 %v573_v3  ;;  %s584_s23 = smov 124  }
   0x7   :  { %570 = vset.pattern.permute.xlu0 %v581_v13 }
   0x8   :  { %523 = vmatpush3.msk.msra.mxu0 %vm23_vm1, %v14_v7  ;;  %177 = vrot.lane.b32.xlu1 %v11_v5, %s576_s17 }
   0x9   :  { %525 = vmatmul.mubr.msk.f32.vlgmr.msra.gmra.mrb[0].mxu0 %vm20_vm2, %v11_v5  ;;  %537 = vmatprep.subr.mxu0 %v573_v3 }
   0xa   :  { %539 = vmatprep.mubr.msk.f32.mxu0 %vm572_vm0, %v573_v3 }
   0xc   :  { %251 = vrot.lane.b32.xlu1 %v11_v5, %s577_s18 }
  0x10   :  { %329 = vrot.lane.b32.xlu1 %v11_v5, %s578_s19 }
  0x14   :  { %407 = vrot.lane.b32.xlu1 %v11_v5, %s579_s20 }
  0x76   :  { %v99_v14 = vpop.permute.xlu1 %98 }
  0x7a   :  { %v178_v15 = vpop.permute.xlu1 %177 }
  0x7e   :  { %v252_v16 = vpop.permute.xlu1 %251 }
  0x82   :  { %v18_v8 = vpop.permute.xlu0 %17  ;;  %v330_v19 = vpop.permute.xlu1 %329 }
  0x86   :  { %v408_v21 = vpop.permute.xlu1 %407 }
  0xdc   :  { %v93_v9 = vpop.f32.mrb[0].mxu0 }
  0xdd   :  { %v94_v10 = vadd.f32 %v93_v9, %v18_v8  ;;  %v526_v11 = vpop.f32.mrb[1].mxu0 }
  0xdf   :  { %v97_v12 = vmax.f32 %v94_v10, 0.0 }
  0xe1   :  { %101 = vrot.lane.b32.xlu0 %v97_v12, %s580_s1 }
  0xe5   :  { %253 = vrot.lane.b32.xlu0 %v97_v12, %s582_s21 }
  0xe9   :  { %331 = vrot.lane.b32.xlu0 %v97_v12, %s583_s22 }
  0xed   :  { %409 = vrot.lane.b32.xlu0 %v97_v12, %s584_s23 }
  0xf1   :  { %486 = vperm.xlu0 %570, %v11_v5  }
 0x153   :  { %v102_v17 = vpop.permute.xlu0 %101 }
 0x154   :  { %528 = vmatpush3.msra.mxu1 %v102_v17 }
 0x155   :  { %530 = vmatmul.mubr.msk.f32.vlgmr.msra.gmra.mrb[0].mxu1 %vm104_vm3, %v99_v14  ;;  %532 = vmatprep.subr.mxu1 %v573_v3 }
 0x156   :  { %533 = vmatpush3.msra.mxu1 %v97_v12  ;;  %534 = vmatprep.mubr.msk.f32.mxu1 %vm572_vm0, %v573_v3 }
 0x157   :  { %v254_v18 = vpop.permute.xlu0 %253  ;;  %542 = vmatprep.subr.mxu1 %v573_v3 }
 0x158   :  { %538 = vmatpush3.msra.mxu0 %v254_v18 }
 0x159   :  { %535 = vmatmul.mubr.msk.f32.vlgmr.msra.gmra.mrb[2].mxu1 %vm104_vm3, %v178_v15  ;;  %540 = vmatmul.mubr.msk.f32.vlgmr.msra.gmra.mrb[2].mxu0 %vm104_vm3, %v252_v16 }
 0x15a   :  { %544 = vmatprep.mubr.msk.f32.mxu1 %vm572_vm0, %v573_v3  ;;  %547 = vmatprep.subr.mxu0 %v573_v3 }
 0x15b   :  { %v332_v20 = vpop.permute.xlu0 %331  ;;  %549 = vmatprep.mubr.msk.f32.mxu0 %vm572_vm0, %v573_v3 }
 0x15c   :  { %543 = vmatpush3.msra.mxu1 %v332_v20 }
 0x15d   :  { %545 = vmatmul.mubr.msk.f32.vlgmr.msra.gmra.mrb[4].mxu1 %vm104_vm3, %v330_v19 }
 0x15f   :  { %v410_v22 = vpop.permute.xlu0 %409 }
 0x160   :  { %548 = vmatpush3.msra.mxu0 %v410_v22 }
 0x161   :  { %550 = vmatmul.mubr.msk.f32.vlgmr.msra.gmra.mrb[4].mxu0 %vm104_vm3, %v408_v21 }
 0x170   :  { %v487_v35 = vpop.permute.xlu0 %486 }
 0x228   :  { %v173_v23 = vpop.f32.mrb[0].mxu1 }
 0x229   :  { %v531_v24 = vpop.f32.mrb[1].mxu1 }
 0x22c   :  { %v247_v25 = vpop.f32.mrb[2].mxu1  ;;  %v324_v26 = vpop.f32.mrb[2].mxu0 }
 0x22d   :  { %v248_v27 = vadd.f32 %v247_v25, %v173_v23  ;;  %v536_v28 = vpop.f32.mrb[3].mxu1  ;;  %v541_v29 = vpop.f32.mrb[3].mxu0 }
 0x22f   :  { %v328_v30 = vadd.f32 %v324_v26, %v248_v27 }
 0x230   :  { %v402_v31 = vpop.f32.mrb[4].mxu1 }
 0x231   :  { %v406_v32 = vadd.f32 %v402_v31, %v328_v30  ;;  %v546_v33 = vpop.f32.mrb[5].mxu1 }
 0x234   :  { %v480_v34 = vpop.f32.mrb[4].mxu0 }
 0x235   :  { %v484_v36 = vadd.f32 %v480_v34, %v406_v32  ;;  %v551_v37 = vpop.f32.mrb[5].mxu0 }
 0x237   :  { %v489_v38 = vadd.f32 %v487_v35, %v484_v36 }
 0x239   :  { %v490_v39 = vmax.f32 %v489_v38, 0.0 }
 0x23b   :  { %492 = vst.msk [vmem:[%s640_s2] sm:$0xff] %vm491_vm4, %v490_v39 }

</bundles_post_ra>
